<compile_context>
chip_gen: v7x
topology: tpu7x:2x2x1
jax: 0.10.0
libtpu: 0.0.40
codegen_flags: <defaults>
</compile_context>

<pallas_src>
import jax
import jax.numpy as jnp
from jax.experimental import pallas as pl
from jax.experimental.pallas import tpu as pltpu

IN_DIM = 10 * 28 * 28  # 7840


def mlp_kernel(x_ref, w1_ref, b1_ref, w2_ref, b2_ref, w3_ref, b3_ref,
               w4_ref, b4_ref, out_ref, acc_ref):
    # Dropout(0.3) == identity in eval mode.
    k = pl.program_id(1)

    @pl.when(k == 0)
    def _():
        acc_ref[...] = jnp.zeros_like(acc_ref)

    # lin1: accumulate this K-tile's partial product in f32 (bf16 MXU inputs).
    acc_ref[...] += jnp.dot(x_ref[...], w1_ref[...],
                            preferred_element_type=jnp.float32)

    @pl.when(k == pl.num_programs(1) - 1)
    def _():
        # Bias + ReLU on the f32 accumulator (VPU work — free filler under the
        # DMA/MXU bottleneck), then the three small layers.
        h = jnp.maximum(acc_ref[...] + b1_ref[...], 0.0)
        h = jnp.dot(h.astype(jnp.bfloat16), w2_ref[...],
                    preferred_element_type=jnp.float32) + b2_ref[...]
        h = jnp.maximum(h, 0.0)
        h = jnp.dot(h.astype(jnp.bfloat16), w3_ref[...],
                    preferred_element_type=jnp.float32) + b3_ref[...]
        h = jnp.maximum(h, 0.0)
        out_ref[...] = (jnp.dot(h.astype(jnp.bfloat16), w4_ref[...],
                                preferred_element_type=jnp.float32)
                        + b4_ref[...])


def prepare_params(params, *, tk=1024):
    """One-time prep: cast weights to bf16; zero-pad W1 rows to a tk multiple."""
    (w1, b1), (w2, b2), (w3, b3), (w4, b4) = params
    k = w1.shape[0]
    k_pad = pl.cdiv(k, tk) * tk
    w1p = jnp.pad(w1, ((0, k_pad - k), (0, 0))).astype(jnp.bfloat16)
    return ((w1p, b1),
            (w2.astype(jnp.bfloat16), b2),
            (w3.astype(jnp.bfloat16), b3),
            (w4.astype(jnp.bfloat16), b4))


def mlp_forward(x_nchw, prepared_params, *, tk=1024):
    """x_nchw: (B, 10, 28, 28) float32.  Returns (B, 10) float32 logits."""
    B = x_nchw.shape[0]
    (w1, b1), (w2, b2), (w3, b3), (w4, b4) = prepared_params
    k_pad, H = w1.shape
    n_out = w4.shape[1]
    assert k_pad % tk == 0

    # Flatten (== input.view(B, 7840)), cast to bf16, zero-pad the feature dim
    # so contraction tiles are lane-aligned (8192 = 64 x 128).
    x = x_nchw.reshape(B, -1).astype(jnp.bfloat16)
    x = jnp.pad(x, ((0, 0), (0, k_pad - x.shape[1])))

    # Batch tiling: "parallel" axis lets v7x's 2 TensorCores split large batches.
    tb = 128 if B % 128 == 0 else B
    grid = (B // tb, k_pad // tk)

    flops = 2 * B * (IN_DIM * H + H * H + H * H + H * n_out)
    bytes_accessed = (x.size * 2                                   # bf16 activations
                      + (w1.size + w2.size + w3.size + w4.size) * 2  # bf16 weights
                      + (b1.size + b2.size + b3.size + b4.size) * 4  # f32 biases
                      + B * n_out * 4)                               # f32 output

    const = lambda i, k: (0, 0)
    return pl.pallas_call(
        mlp_kernel,
        out_shape=jax.ShapeDtypeStruct((B, n_out), jnp.float32),
        grid_spec=pltpu.PrefetchScalarGridSpec(
            num_scalar_prefetch=0,
            grid=grid,
            in_specs=[
                pl.BlockSpec((tb, tk), lambda i, k: (i, k)),   # x   (streamed over K)
                pl.BlockSpec((tk, H), lambda i, k: (k, 0)),    # W1  (streamed over K)
                pl.BlockSpec((1, H), const),                   # b1
                pl.BlockSpec((H, H), const),                   # W2  (resident)
                pl.BlockSpec((1, H), const),                   # b2
                pl.BlockSpec((H, H), const),                   # W3  (resident)
                pl.BlockSpec((1, H), const),                   # b3
                pl.BlockSpec((H, n_out), const),               # W4  (resident)
                pl.BlockSpec((1, n_out), const),               # b4
            ],
            out_specs=pl.BlockSpec((tb, n_out), lambda i, k: (i, 0)),
            scratch_shapes=[pltpu.VMEM((tb, H), jnp.float32)],
        ),
        compiler_params=pltpu.CompilerParams(
            dimension_semantics=("parallel", "arbitrary"),
            vmem_limit_bytes=16 << 20,
        ),
        cost_estimate=pl.CostEstimate(flops=flops, transcendentals=0,
                                      bytes_accessed=bytes_accessed),
    )(x, w1, b1, w2, b2, w3, b3, w4, b4)


def xavier_uniform(key, fan_in, fan_out):
    # matches torch.nn.init.xavier_uniform_ (gain=1)
    bound = (6.0 / (fan_in + fan_out)) ** 0.5
    # stored transposed: (in, out)
    return jax.random.uniform(key, (fan_in, fan_out), jnp.float32, -bound, bound)


def init_params(key, hidden_dim):
    dims = [(IN_DIM, hidden_dim),
            (hidden_dim, hidden_dim),
            (hidden_dim, hidden_dim),
            (hidden_dim, 10)]
    keys = jax.random.split(key, len(dims))
    params = []
    for k, (fi, fo) in zip(keys, dims):
        w = xavier_uniform(k, fi, fo)
        b = jnp.zeros((1, fo), jnp.float32)  # nn.init.zeros_(bias), kept 2-D
        params.append((w, b))
    return params


def reference_forward(x_nchw, params):
    x = x_nchw.reshape(x_nchw.shape[0], -1)
    (w1, b1), (w2, b2), (w3, b3), (w4, b4) = params
    h = jnp.maximum(x @ w1 + b1, 0.0)
    h = jnp.maximum(h @ w2 + b2, 0.0)
    h = jnp.maximum(h @ w3 + b3, 0.0)
    return h @ w4 + b4


if __name__ == "__main__":
    key = jax.random.PRNGKey(0)
    k_x, k_p = jax.random.split(key)

    batch = 2
    hidden_dim = 128  # small hidden size for the demo; in_features fixed at 7840

    x = jax.random.normal(k_x, (batch, 10, 28, 28), jnp.float32)
    params = init_params(k_p, hidden_dim)          # f32 params (PyTorch-equivalent init)
    prepared = prepare_params(params)              # one-time bf16 cast + K padding

    out = jax.block_until_ready(mlp_forward(x, prepared))

    ref = reference_forward(x, params)             # f32 reference
    assert out.shape == (batch, 10)
    # bf16 weights/activations vs. the f32 reference -> loosened tolerance.
    assert jnp.allclose(out, ref, atol=1e-1, rtol=1e-1), \
        float(jnp.max(jnp.abs(out - ref)))

    print("KERNEL_OK")
</pallas_src>

<mosaic_0001>
module attributes {stable_mosaic.version = 11 : i64} {
  func.func @mlp_kernel(%arg0: i32, %arg1: i32, %arg2: memref<2x1024xbf16, #tpu.memory_space<vmem>>, %arg3: memref<1024x128xbf16, #tpu.memory_space<vmem>>, %arg4: memref<1x128xf32, #tpu.memory_space<vmem>>, %arg5: memref<128x128xbf16, #tpu.memory_space<vmem>>, %arg6: memref<1x128xf32, #tpu.memory_space<vmem>>, %arg7: memref<128x128xbf16, #tpu.memory_space<vmem>>, %arg8: memref<1x128xf32, #tpu.memory_space<vmem>>, %arg9: memref<128x10xbf16, #tpu.memory_space<vmem>>, %arg10: memref<1x10xf32, #tpu.memory_space<vmem>>, %arg11: memref<2x10xf32, #tpu.memory_space<vmem>>, %arg12: memref<2x128xf32, #tpu.memory_space<vmem>>) attributes {dimension_semantics = [#tpu.dimension_semantics<parallel>, #tpu.dimension_semantics<arbitrary>], iteration_bounds = array<i64: 1, 8>, scalar_prefetch = 0 : i64, scratch_operands = 1 : i64, tpu.core_type = #tpu.core_type<tc>, window_params = [{transform_indices = @transform_0, window_bounds = array<i64: 2, 1024>}, {transform_indices = @transform_1, window_bounds = array<i64: 1024, 128>}, {pipeline_mode = #tpu.pipeline_mode<synchronous>, transform_indices = @transform_2, window_bounds = array<i64: 1, 128>}, {pipeline_mode = #tpu.pipeline_mode<synchronous>, transform_indices = @transform_3, window_bounds = array<i64: 128, 128>}, {pipeline_mode = #tpu.pipeline_mode<synchronous>, transform_indices = @transform_4, window_bounds = array<i64: 1, 128>}, {pipeline_mode = #tpu.pipeline_mode<synchronous>, transform_indices = @transform_5, window_bounds = array<i64: 128, 128>}, {pipeline_mode = #tpu.pipeline_mode<synchronous>, transform_indices = @transform_6, window_bounds = array<i64: 1, 128>}, {pipeline_mode = #tpu.pipeline_mode<synchronous>, transform_indices = @transform_7, window_bounds = array<i64: 128, 10>}, {pipeline_mode = #tpu.pipeline_mode<synchronous>, transform_indices = @transform_8, window_bounds = array<i64: 1, 10>}, {transform_indices = @transform_9, window_bounds = array<i64: 2, 10>}]} {
    %c0_i32 = arith.constant 0 : i32
    %0 = arith.cmpi eq, %arg1, %c0_i32 : i32
    %1 = arith.extui %0 : i1 to i32
    %c0_i32_0 = arith.constant 0 : i32
    %2 = arith.cmpi ne, %1, %c0_i32_0 : i32
    scf.if %2 {
      %cst_9 = arith.constant 0.000000e+00 : f32
      %12 = vector.broadcast %cst_9 : f32 to vector<2x128xf32>
      %c0_10 = arith.constant 0 : index
      %c0_11 = arith.constant 0 : index
      %13 = vector.load %arg12[%c0_10, %c0_11] : memref<2x128xf32, #tpu.memory_space<vmem>>, vector<2x128xf32>
      tpu.vector_store %arg12[%c0_10, %c0_11], %12 {strides = array<i32>} : memref<2x128xf32, #tpu.memory_space<vmem>>, vector<2x128xf32>,
    } else {
    }
    %c0 = arith.constant 0 : index
    %c0_1 = arith.constant 0 : index
    %3 = vector.load %arg12[%c0, %c0_1] : memref<2x128xf32, #tpu.memory_space<vmem>>, vector<2x128xf32>
    %c0_2 = arith.constant 0 : index
    %c0_3 = arith.constant 0 : index
    %4 = vector.load %arg2[%c0_2, %c0_3] : memref<2x1024xbf16, #tpu.memory_space<vmem>>, vector<2x1024xbf16>
    %c0_4 = arith.constant 0 : index
    %c0_5 = arith.constant 0 : index
    %5 = vector.load %arg3[%c0_4, %c0_5] : memref<1024x128xbf16, #tpu.memory_space<vmem>>, vector<1024x128xbf16>
    %cst = arith.constant dense<0.000000e+00> : vector<2x128xf32>
    %6 = tpu.matmul %4, %5, %cst {dimension_numbers = #tpu.dot_dimension_numbers<[1], [0], [0], [1], [0, 0, 1, 1], [], []>} : vector<2x1024xbf16>, vector<1024x128xbf16>, vector<2x128xf32> -> vector<2x128xf32>
    %7 = arith.addf %3, %6 : vector<2x128xf32>
    %c0_6 = arith.constant 0 : index
    %c0_7 = arith.constant 0 : index
    %8 = vector.load %arg12[%c0_6, %c0_7] : memref<2x128xf32, #tpu.memory_space<vmem>>, vector<2x128xf32>
    tpu.vector_store %arg12[%c0_6, %c0_7], %7 {strides = array<i32>} : memref<2x128xf32, #tpu.memory_space<vmem>>, vector<2x128xf32>,
    %c7_i32 = arith.constant 7 : i32
    %9 = arith.cmpi eq, %arg1, %c7_i32 : i32
    %10 = arith.extui %9 : i1 to i32
    %c0_i32_8 = arith.constant 0 : i32
    %11 = arith.cmpi ne, %10, %c0_i32_8 : i32
    scf.if %11 {
      %c0_9 = arith.constant 0 : index
      %c0_10 = arith.constant 0 : index
      %12 = vector.load %arg12[%c0_9, %c0_10] : memref<2x128xf32, #tpu.memory_space<vmem>>, vector<2x128xf32>
      %c0_11 = arith.constant 0 : index
      %c0_12 = arith.constant 0 : index
      %13 = vector.load %arg4[%c0_11, %c0_12] : memref<1x128xf32, #tpu.memory_space<vmem>>, vector<1x128xf32>
      %14 = vector.broadcast %13 : vector<1x128xf32> to vector<2x128xf32>
      %15 = arith.addf %12, %14 : vector<2x128xf32>
      %cst_13 = arith.constant 0.000000e+00 : f32
      %16 = vector.broadcast %cst_13 : f32 to vector<2x128xf32>
      %17 = arith.maximumf %15, %16 : vector<2x128xf32>
      %18 = arith.truncf %17 : vector<2x128xf32> to vector<2x128xbf16>
      %c0_14 = arith.constant 0 : index
      %c0_15 = arith.constant 0 : index
      %19 = vector.load %arg5[%c0_14, %c0_15] : memref<128x128xbf16, #tpu.memory_space<vmem>>, vector<128x128xbf16>
      %cst_16 = arith.constant dense<0.000000e+00> : vector<2x128xf32>
      %20 = tpu.matmul %18, %19, %cst_16 {dimension_numbers = #tpu.dot_dimension_numbers<[1], [0], [0], [1], [0, 0, 1, 1], [], []>} : vector<2x128xbf16>, vector<128x128xbf16>, vector<2x128xf32> -> vector<2x128xf32>
      %c0_17 = arith.constant 0 : index
      %c0_18 = arith.constant 0 : index
      %21 = vector.load %arg6[%c0_17, %c0_18] : memref<1x128xf32, #tpu.memory_space<vmem>>, vector<1x128xf32>
      %22 = vector.broadcast %21 : vector<1x128xf32> to vector<2x128xf32>
      %23 = arith.addf %20, %22 : vector<2x128xf32>
      %cst_19 = arith.constant 0.000000e+00 : f32
      %24 = vector.broadcast %cst_19 : f32 to vector<2x128xf32>
      %25 = arith.maximumf %23, %24 : vector<2x128xf32>
      %26 = arith.truncf %25 : vector<2x128xf32> to vector<2x128xbf16>
      %c0_20 = arith.constant 0 : index
      %c0_21 = arith.constant 0 : index
      %27 = vector.load %arg7[%c0_20, %c0_21] : memref<128x128xbf16, #tpu.memory_space<vmem>>, vector<128x128xbf16>
      %cst_22 = arith.constant dense<0.000000e+00> : vector<2x128xf32>
      %28 = tpu.matmul %26, %27, %cst_22 {dimension_numbers = #tpu.dot_dimension_numbers<[1], [0], [0], [1], [0, 0, 1, 1], [], []>} : vector<2x128xbf16>, vector<128x128xbf16>, vector<2x128xf32> -> vector<2x128xf32>
      %c0_23 = arith.constant 0 : index
      %c0_24 = arith.constant 0 : index
      %29 = vector.load %arg8[%c0_23, %c0_24] : memref<1x128xf32, #tpu.memory_space<vmem>>, vector<1x128xf32>
      %30 = vector.broadcast %29 : vector<1x128xf32> to vector<2x128xf32>
      %31 = arith.addf %28, %30 : vector<2x128xf32>
      %cst_25 = arith.constant 0.000000e+00 : f32
      %32 = vector.broadcast %cst_25 : f32 to vector<2x128xf32>
      %33 = arith.maximumf %31, %32 : vector<2x128xf32>
      %34 = arith.truncf %33 : vector<2x128xf32> to vector<2x128xbf16>
      %c0_26 = arith.constant 0 : index
      %c0_27 = arith.constant 0 : index
      %35 = vector.load %arg9[%c0_26, %c0_27] : memref<128x10xbf16, #tpu.memory_space<vmem>>, vector<128x10xbf16>
      %cst_28 = arith.constant dense<0.000000e+00> : vector<2x10xf32>
      %36 = tpu.matmul %34, %35, %cst_28 {dimension_numbers = #tpu.dot_dimension_numbers<[1], [0], [0], [1], [0, 0, 1, 1], [], []>} : vector<2x128xbf16>, vector<128x10xbf16>, vector<2x10xf32> -> vector<2x10xf32>
      %c0_29 = arith.constant 0 : index
      %c0_30 = arith.constant 0 : index
      %37 = vector.load %arg10[%c0_29, %c0_30] : memref<1x10xf32, #tpu.memory_space<vmem>>, vector<1x10xf32>
      %38 = vector.broadcast %37 : vector<1x10xf32> to vector<2x10xf32>
      %39 = arith.addf %36, %38 : vector<2x10xf32>
      %c0_31 = arith.constant 0 : index
      %c0_32 = arith.constant 0 : index
      %40 = vector.load %arg11[%c0_31, %c0_32] : memref<2x10xf32, #tpu.memory_space<vmem>>, vector<2x10xf32>
      tpu.vector_store %arg11[%c0_31, %c0_32], %39 {strides = array<i32>} : memref<2x10xf32, #tpu.memory_space<vmem>>, vector<2x10xf32>,
    } else {
    }
    return
  }
  func.func @transform_0(%arg0: i32, %arg1: i32) -> (i32, i32) {
    %c0_i32 = arith.constant 0 : i32
    return %arg0, %arg1 : i32, i32
  }
  func.func @transform_1(%arg0: i32, %arg1: i32) -> (i32, i32) {
    %c0_i32 = arith.constant 0 : i32
    %c0_i32_0 = arith.constant 0 : i32
    return %arg1, %c0_i32 : i32, i32
  }
  func.func @transform_2(%arg0: i32, %arg1: i32) -> (i32, i32) {
    %c0_i32 = arith.constant 0 : i32
    %c0_i32_0 = arith.constant 0 : i32
    %c0_i32_1 = arith.constant 0 : i32
    return %c0_i32, %c0_i32_0 : i32, i32
  }
  func.func @transform_3(%arg0: i32, %arg1: i32) -> (i32, i32) {
    %c0_i32 = arith.constant 0 : i32
    %c0_i32_0 = arith.constant 0 : i32
    %c0_i32_1 = arith.constant 0 : i32
    return %c0_i32, %c0_i32_0 : i32, i32
  }
  func.func @transform_4(%arg0: i32, %arg1: i32) -> (i32, i32) {
    %c0_i32 = arith.constant 0 : i32
    %c0_i32_0 = arith.constant 0 : i32
    %c0_i32_1 = arith.constant 0 : i32
    return %c0_i32, %c0_i32_0 : i32, i32
  }
  func.func @transform_5(%arg0: i32, %arg1: i32) -> (i32, i32) {
    %c0_i32 = arith.constant 0 : i32
    %c0_i32_0 = arith.constant 0 : i32
    %c0_i32_1 = arith.constant 0 : i32
    return %c0_i32, %c0_i32_0 : i32, i32
  }
  func.func @transform_6(%arg0: i32, %arg1: i32) -> (i32, i32) {
    %c0_i32 = arith.constant 0 : i32
    %c0_i32_0 = arith.constant 0 : i32
    %c0_i32_1 = arith.constant 0 : i32
    return %c0_i32, %c0_i32_0 : i32, i32
  }
  func.func @transform_7(%arg0: i32, %arg1: i32) -> (i32, i32) {
    %c0_i32 = arith.constant 0 : i32
    %c0_i32_0 = arith.constant 0 : i32
    %c0_i32_1 = arith.constant 0 : i32
    return %c0_i32, %c0_i32_0 : i32, i32
  }
  func.func @transform_8(%arg0: i32, %arg1: i32) -> (i32, i32) {
    %c0_i32 = arith.constant 0 : i32
    %c0_i32_0 = arith.constant 0 : i32
    %c0_i32_1 = arith.constant 0 : i32
    return %c0_i32, %c0_i32_0 : i32, i32
  }
  func.func @transform_9(%arg0: i32, %arg1: i32) -> (i32, i32) {
    %c0_i32 = arith.constant 0 : i32
    %c0_i32_0 = arith.constant 0 : i32
    return %arg0, %c0_i32 : i32, i32
  }
}

</mosaic_0001>

<bundles_post_ra>
// kernel: tpu_custom_call.1
= control target key start
LH: loop header
LB: loop body
LE: loop exit
PB: predicated region body
PF: predicated region fallthrough
CT: control target
= control target key end

     0   :  { %s3140_s0 = inlined_call_operand.hbm [shape: bf16[2,8192], index: 0, kind: input, shape index: {}]   ;;  %s3141_s1 = inlined_call_operand.hbm [shape: bf16[8192,128], index: 1, kind: input, shape index: {}]   ;;  %s3142_s2 = inlined_call_operand.hbm [shape: f32[1,128], index: 2, kind: input, shape index: {}]   ;;  %s3143_s3 = inlined_call_operand.hbm [shape: bf16[128,128], index: 3, kind: input, shape index: {}]   ;;  %s3144_s4 = inlined_call_operand.hbm [shape: f32[1,128], index: 4, kind: input, shape index: {}]   ;;  %s3145_s5 = inlined_call_operand.hbm [shape: bf16[128,128], index: 5, kind: input, shape index: {}]   ;;  %s3146_s6 = inlined_call_operand.hbm [shape: f32[1,128], index: 6, kind: input, shape index: {}]   ;;  %s3147_s7 = inlined_call_operand.vmem [shape: bf16[128,10], index: 7, kind: input, shape index: {}]   ;;  %s3148_s8 = inlined_call_operand.hbm [shape: f32[1,10], index: 8, kind: input, shape index: {}]   ;;  %s3149_s9 = inlined_call_operand.hbm [shape: f32[2,10], index: 9, kind: output, shape index: {}]  }
   0x1   :  { %3156 = sst [smem:[#allocation25_spill]] %s3142_s2 }
   0x2   :  { %3157 = sst [smem:[#allocation26_spill]] %s3143_s3 }
   0x3   :  { %3158 = sst [smem:[#allocation27_spill]] %s3147_s7 }
   0x4   :  { %3159 = sst [smem:[#allocation28_spill]] %s3149_s9 }
   0x5   :  { %14 = vsyncpa [#allocation4], 0 }
   0x6   :  { %16 = vsyncpa [#allocation4 + $0x1], 0 }
   0x7   :  { %17 = vsyncpa [#allocation7], 0 }
   0x8   :  { %19 = vsyncpa [#allocation7 + $0x1], 0 }
   0x9   :  { %20 = vsyncpa [#allocation10], 0 }
   0xa   :  { %21 = vsyncpa [#allocation13], 0 }
   0xb   :  { %22 = vsyncpa [#allocation16], 0 }
   0xc   :  { %23 = vsyncpa [#allocation5], 0  ;;  %s2643_s30 = smov 0   ;;  %s2645_s10 = smov 0  }
   0xd   :  { %s2647_s11 = smov 0   ;;  %s2649_s12 = smov 0  }
   0xe   :  { %s2651_s13 = smov 0   ;;  %s2653_s14 = smov 0  }
   0xf LB: > { %s2674_s15 = sadd.s32 4294967295, %s2576_s14   ;;  %p1727_p0 = scmp.ge.s32.totalorder %s2576_s14, 1  ;;  %s2576_s14 = sphi %s2653_s14, %s29_s14   ;;  %s2572_s13 = sphi %s2651_s13, %s3186_s13   ;;  %s2568_s12 = sphi %s2649_s12, %s3185_s12   ;;  %s2564_s11 = sphi %s2647_s11, %s3184_s11   ;;  %s2560_s10 = sphi %s2645_s10, %s3183_s10   ;;  %s2556_s30 = sphi %s2643_s30, %s3182_s30  }
  0x10   : > { %p3150_p1 = scmp.eq.s32.totalorder %s2674_s15, 0  ;;  %p273_p2 = scmp.lt.s32.totalorder %s2576_s14, 9 }
  0x11   : > { %s2578_s17 = smov [#allocation8]   ;;  %s2579_s19 = smov [#allocation9]  }
  0x12   : > { %p2679_p3 = pnand %p1727_p0, %p273_p2  ;;  %s286_s18 = sshll.u32 %s2578_s17, 4  ;;  %s287_s18 = int_to_ptr.vmem [resolvable:$true] %s286_s18 }
  0x13   : > { %s296_s20 = sshll.u32 %s2579_s19, 4  ;;  %s2580_s22 = smov [#allocation12]   ;;  %s2691_s20 = int_to_ptr.vmem [resolvable:$true] %s296_s20 }
  0x14   : > { %s3160_s16 = scalar_select %p2679_p3, 1, 0 }
  0x15   : > { %p2057_p4 = pneg %p2679_p3  ;;  %s2693_s23 = sshll.u32 %s2580_s22, 4  ;;  %s321_s23 = int_to_ptr.vmem [resolvable:$true] %s2693_s23 }
  0x16   : > { %s3162_s2 = sld [smem:[#allocation25_spill]] }
  0x17   : > { %p2687_p5 = pnand %p2057_p4, %p3150_p1 }
  0x19   : > { %p2703_p7 = pneg %p2687_p5 }
  0x1c   : > { %s2248_s26 = scalar_lea.hbm %s3162_s2, 16 }
  0x1d   : > { %p2249_p6 = scmp.ne.s32.totalorder %s3162_s2, %s2248_s26  ;;  %p2255_p10 = scmp.lt.u32.totalorder %s2248_s26, %s3162_s2 }
  0x1f   : > { %p2251_p8 = pnand %p2703_p7, %p2249_p6 }
  0x21   : > { %p2252_p9 = pneg %p2251_p8 }
  0x23   : > { %p2257_p11 = pnand %p2255_p10, %p2252_p9 }
  0x25   : > { %2260 = shalt.err (!%p2257_p11)
}
  0x26   : > { %s2261_s22 = scalar_lea.vmem %s287_s18, 16  ;;  %s2268_s24 = scalar_lea.vmem %s287_s18, 32 }
  0x27   : > { %p2262_p12 = scmp.ne.s32.totalorder %s287_s18, %s2261_s22  ;;  %p2269_p2 = scmp.lt.s32.totalorder %s287_s18, %s287_s18 }
  0x28   : > { %p2270_p4 = scmp.lt.s32.totalorder %s2268_s24, %s2261_s22 }
  0x29   : > { %p2264_p13 = pnand %p2262_p12, %p2703_p7 }
  0x2a   : > { %p2271_p1 = por %p2270_p4, %p2269_p2 }
  0x2b   : > { %p2265_p0 = pneg %p2264_p13 }
  0x2d   : > { %p2272_p3 = pnand %p2271_p1, %p2265_p0 }
  0x2f   : > { %2275 = shalt.err (!%p2272_p3)
}
  0x30   : > { %2060 = dma.hbm_to_vmem [thread:$0]  (!%p2687_p5), %s3162_s2, 16, %s287_s18, [#allocation7]  }
  0x31   : > { %s3164_s3 = sld [smem:[#allocation26_spill]] }
  0x37   : > { %s2276_s17 = scalar_lea.hbm %s3164_s3, 1024 }
  0x38   : > { %p2277_p6 = scmp.ne.s32.totalorder %s3164_s3, %s2276_s17  ;;  %p2283_p1 = scmp.lt.u32.totalorder %s2276_s17, %s3164_s3 }
  0x3a   : > { %p2279_p8 = pnand %p2277_p6, %p2703_p7 }
  0x3c   : > { %p2280_p9 = pneg %p2279_p8 }
  0x3e   : > { %p2285_p3 = pnand %p2283_p1, %p2280_p9 }
  0x40   : > { %2288 = shalt.err (!%p2285_p3)
}
  0x41   : > { %s2289_s18 = scalar_lea.vmem %s2691_s20, 1024  ;;  %p2297_p13 = scmp.lt.s32.totalorder %s2691_s20, %s2691_s20 }
  0x42   : > { %p2290_p10 = scmp.ne.s32.totalorder %s2691_s20, %s2289_s18  ;;  %p2298_p0 = scmp.lt.s32.totalorder %s2289_s18, %s2289_s18 }
  0x44   : > { %p2292_p11 = pnand %p2290_p10, %p2703_p7  ;;  %p2299_p2 = por %p2298_p0, %p2297_p13 }
  0x46   : > { %p2293_p12 = pneg %p2292_p11 }
  0x48   : > { %p2300_p4 = pnand %p2299_p2, %p2293_p12 }
  0x4a   : > { %2303 = shalt.err (!%p2300_p4)
}
  0x4b   : > { %s3154_s9 = smov 64   ;;  %s3155_s25 = smov 4  }
  0x4c   : > { %2063 = dma.hbm_to_vmem [thread:$0]  (!%p2687_p5), %s3164_s3, 1024, %s2691_s20, [#allocation10], %s3154_s9, %s3154_s9, %s3155_s25  }
  0x4d   : > { %s2304_s19 = scalar_lea.hbm %s3145_s5, 1024 }
  0x4e   : > { %p2305_p6 = scmp.ne.s32.totalorder %s3145_s5, %s2304_s19  ;;  %p2311_p1 = scmp.lt.u32.totalorder %s2304_s19, %s3145_s5 }
  0x50   : > { %p2307_p8 = pnand %p2305_p6, %p2703_p7 }
  0x52   : > { %p2308_p9 = pneg %p2307_p8 }
  0x54   : > { %p2313_p3 = pnand %p2311_p1, %p2308_p9 }
  0x56   : > { %2316 = shalt.err (!%p2313_p3)
}
  0x57   : > { %s2317_s27 = scalar_lea.vmem %s321_s23, 1024  ;;  %p2325_p13 = scmp.lt.s32.totalorder %s321_s23, %s321_s23 }
  0x58   : > { %p2318_p10 = scmp.ne.s32.totalorder %s321_s23, %s2317_s27  ;;  %p2326_p0 = scmp.lt.s32.totalorder %s2317_s27, %s2317_s27 }
  0x5a   : > { %p2320_p11 = pnand %p2318_p10, %p2703_p7  ;;  %p2327_p2 = por %p2326_p0, %p2325_p13 }
  0x5c   : > { %p2321_p12 = pneg %p2320_p11 }
  0x5e   : > { %p2328_p4 = pnand %p2327_p2, %p2321_p12 }
  0x60   : > { %2331 = shalt.err (!%p2328_p4)
}
  0x61   : > { %2069 = dma.hbm_to_vmem [thread:$0]  (!%p2687_p5), %s3145_s5, 1024, %s321_s23, [#allocation13], %s3154_s9, %s3154_s9, %s3155_s25  }
  0x62   : > { %s2583_s26 = smov [#allocation11]   ;;  %s2584_s17 = smov [#allocation14]  }
  0x63   : > { %s310_s28 = sshll.u32 %s2583_s26, 4  ;;  %s334_s19 = sshll.u32 %s2584_s17, 4  ;;  %s311_s28 = int_to_ptr.vmem [resolvable:$true] %s310_s28  ;;  %s335_s19 = int_to_ptr.vmem [resolvable:$true] %s334_s19 }
  0x64   : > { %s2332_s18 = scalar_lea.hbm %s3144_s4, 16 }
  0x65   : > { %p2333_p6 = scmp.ne.s32.totalorder %s3144_s4, %s2332_s18  ;;  %p2339_p1 = scmp.lt.u32.totalorder %s2332_s18, %s3144_s4 }
  0x67   : > { %p2335_p8 = pnand %p2333_p6, %p2703_p7 }
  0x69   : > { %p2336_p9 = pneg %p2335_p8 }
  0x6b   : > { %p2341_p3 = pnand %p2339_p1, %p2336_p9 }
  0x6d   : > { %2344 = shalt.err (!%p2341_p3)
}
  0x6e   : > { %s2345_s23 = scalar_lea.vmem %s311_s28, 16  ;;  %s2352_s20 = scalar_lea.vmem %s311_s28, 32 }
  0x6f   : > { %p2346_p10 = scmp.ne.s32.totalorder %s311_s28, %s2345_s23  ;;  %p2353_p13 = scmp.lt.s32.totalorder %s311_s28, %s311_s28 }
  0x70   : > { %p2354_p0 = scmp.lt.s32.totalorder %s2352_s20, %s2345_s23 }
  0x71   : > { %p2348_p11 = pnand %p2346_p10, %p2703_p7 }
  0x72   : > { %p2355_p2 = por %p2354_p0, %p2353_p13 }
  0x73   : > { %p2349_p12 = pneg %p2348_p11 }
  0x75   : > { %p2356_p4 = pnand %p2355_p2, %p2349_p12 }
  0x77   : > { %2359 = shalt.err (!%p2356_p4)
}
  0x78   : > { %2066 = dma.hbm_to_vmem [thread:$0]  (!%p2687_p5), %s3144_s4, 16, %s311_s28, [#allocation10]  }
  0x79   : > { %s2360_s22 = scalar_lea.hbm %s3146_s6, 16 }
  0x7a   : > { %p2361_p6 = scmp.ne.s32.totalorder %s3146_s6, %s2360_s22  ;;  %p2367_p1 = scmp.lt.u32.totalorder %s2360_s22, %s3146_s6 }
  0x7c   : > { %p2363_p8 = pnand %p2361_p6, %p2703_p7 }
  0x7e   : > { %p2364_p9 = pneg %p2363_p8 }
  0x80   : > { %p2369_p3 = pnand %p2367_p1, %p2364_p9 }
  0x82   : > { %2372 = shalt.err (!%p2369_p3)
}
  0x83   : > { %s2373_s23 = scalar_lea.vmem %s335_s19, 16  ;;  %s2380_s28 = scalar_lea.vmem %s335_s19, 32 }
  0x84   : > { %p2374_p10 = scmp.ne.s32.totalorder %s335_s19, %s2373_s23  ;;  %p2381_p13 = scmp.lt.s32.totalorder %s335_s19, %s335_s19 }
  0x85   : > { %p2382_p0 = scmp.lt.s32.totalorder %s2380_s28, %s2373_s23 }
  0x86   : > { %p2376_p11 = pnand %p2374_p10, %p2703_p7 }
  0x87   : > { %p2383_p2 = por %p2382_p0, %p2381_p13 }
  0x88   : > { %p2377_p12 = pneg %p2376_p11 }
  0x8a   : > { %p2384_p4 = pnand %p2383_p2, %p2377_p12 }
  0x8c   : > { %2387 = shalt.err (!%p2384_p4)
}
  0x8d   : > { %2072 = dma.hbm_to_vmem [thread:$0]  (!%p2687_p5), %s3146_s6, 16, %s335_s19, [#allocation13]  }
  0x8e   : > { %s2585_s26 = smov [#allocation15]   ;;  %s2388_s24 = scalar_lea.hbm %s3148_s8, 16 }
  0x8f   : > { %s348_s7 = sshll.u32 %s2585_s26, 4  ;;  %p2389_p6 = scmp.ne.s32.totalorder %s3148_s8, %s2388_s24  ;;  %s349_s7 = int_to_ptr.vmem [resolvable:$true] %s348_s7 }
  0x90   : > { %p2395_p1 = scmp.lt.u32.totalorder %s2388_s24, %s3148_s8 }
  0x91   : > { %p2391_p8 = pnand %p2389_p6, %p2703_p7 }
  0x93   : > { %p2392_p9 = pneg %p2391_p8 }
  0x95   : > { %p2397_p3 = pnand %p2395_p1, %p2392_p9 }
  0x97   : > { %2400 = shalt.err (!%p2397_p3)
}
  0x98   : > { %s2401_s19 = scalar_lea.vmem %s349_s7, 16  ;;  %s2408_s28 = scalar_lea.vmem %s349_s7, 32 }
  0x99   : > { %p2402_p10 = scmp.ne.s32.totalorder %s349_s7, %s2401_s19  ;;  %p2409_p13 = scmp.lt.s32.totalorder %s349_s7, %s349_s7 }
  0x9a   : > { %p2410_p0 = scmp.lt.s32.totalorder %s2408_s28, %s2401_s19 }
  0x9b   : > { %p2404_p11 = pnand %p2402_p10, %p2703_p7 }
  0x9c   : > { %p2411_p2 = por %p2410_p0, %p2409_p13 }
  0x9d   : > { %p2405_p12 = pneg %p2404_p11 }
  0x9f   : > { %p2412_p4 = pnand %p2411_p2, %p2405_p12 }
  0xa1   : > { %2415 = shalt.err (!%p2412_p4)
}
  0xa2   : > { %2075 = dma.hbm_to_vmem [thread:$0]  (!%p2687_p5), %s3148_s8, 16, %s349_s7, [#allocation16]  }
  0xa3   : > { %s38_s29 = sadd.s32 1, %s2572_s13  ;;  %s50_s26 = sadd.s32 1, %s2564_s11 }
  0xa4   : > { %p39_p7 = scmp.ge.s32.totalorder %s38_s29, 8  ;;  %p57_p6 = scmp.ne.s32.totalorder %s2564_s11, %s2560_s10 }
  0xa5   : > { %p58_p8 = scmp.eq.s32.totalorder %s2576_s14, 0  ;;  %p63_p9 = scmp.ne.s32.totalorder %s2560_s10, %s2556_s30 }
  0xa6   : > { %s3188_s29 = smov (%p39_p7, %s38_s29), 0  ;;  %p3166_p3 = scmp.eq.s32.totalorder %s2674_s15, 0 }
  0xa7   : > { %p2830_p1 = por %p58_p8, %p57_p6  ;;  %s46_s7 = ssub.s32 %s2572_s13, %s3188_s29 }
  0xa8   : > { %p2836_p10 = por %p3166_p3, %p63_p9  ;;  %p2089_p5 = scmp.lt.s32.totalorder %s2576_s14, 8 }
  0xa9   : > { %p48_p11 = scmp.eq.s32.totalorder %s46_s7, 0  ;;  %s2844_s22 = sand.u32 1, %s2564_s11  }
  0xaa   : > { %s1735_s30 = sshll.u32 %s2844_s22, 3  ;;  %s1848_s18 = sshll.u32 %s2572_s13, 7 }
  0xab   : > { %s2848_s24 = scalar_select %p48_p11, %s2564_s11, %s50_s26  }
  0xac   : > { %s2854_s23 = scalar_lea.hbm %s3140_s0, %s1848_s18  ;;  %s363_s19 = scalar_lea.vmem [#allocation3], %s1735_s30 }
  0xad   : > { %s373_s28 = sshll.u32 %s363_s19, 4  ;;  %p2860_p12 = pnand %p2089_p5, %p2830_p1  ;;  %s2856_s28 = int_to_ptr.vmem [resolvable:$true] %s373_s28 }
  0xae   : > { %s1738_s3 = sshll.u32 %s2844_s22, 9  ;;  %s1849_s26 = sshll.u32 %s2572_s13, 13 }
  0xaf   : > { %s360_s7 = scalar_lea.sflag [#allocation4], %s2844_s22  ;;  %s2416_s18 = scalar_lea.hbm %s2854_s23, 128 }
  0xb0   : > { %p2417_p13 = scmp.ne.s32.totalorder %s2854_s23, %s2416_s18  ;;  %p2418_p0 = pneg %p2860_p12 }
  0xb1   : > { %s2421_s21 = scalar_lea.hbm %s3140_s0, 1024  ;;  %p2422_p7 = scmp.lt.u32.totalorder %s2854_s23, %s3140_s0 }
  0xb2   : > { %p2419_p2 = pnand %p2418_p0, %p2417_p13  ;;  %p2423_p6 = scmp.lt.u32.totalorder %s2421_s21, %s2416_s18 }
  0xb3   : > { %p2425_p9 = scmp.lt.u32.totalorder %s2416_s18, %s2854_s23 }
  0xb4   : > { %p2420_p4 = pneg %p2419_p2  ;;  %p2424_p8 = por %p2423_p6, %p2422_p7 }
  0xb6   : > { %p2426_p1 = por %p2425_p9, %p2424_p8 }
  0xb8   : > { %p2427_p3 = pnand %p2426_p1, %p2420_p4 }
  0xba   : > { %2430 = shalt.err (!%p2427_p3)
}
  0xbb   : > { %s2431_s9 = scalar_lea.vmem %s2856_s28, 128  ;;  %s2586_s30 = smov [#allocation3]  }
  0xbc   : > { %p2432_p5 = scmp.ne.s32.totalorder %s2856_s28, %s2431_s9  ;;  %s2436_s27 = sshll.u32 %s2586_s30, 4  ;;  %s2437_s27 = int_to_ptr.vmem [resolvable:$false] %s2436_s27 }
  0xbd   : > { %s2438_s2 = scalar_lea.vmem %s2437_s27, 256  ;;  %p2439_p2 = scmp.lt.s32.totalorder %s2856_s28, %s2437_s27 }
  0xbe   : > { %p2434_p11 = pnand %p2432_p5, %p2418_p0  ;;  %p2440_p7 = scmp.lt.s32.totalorder %s2438_s2, %s2431_s9 }
  0xc0   : > { %p2435_p13 = pneg %p2434_p11  ;;  %p2441_p6 = por %p2440_p7, %p2439_p2 }
  0xc2   : > { %p2442_p8 = pnand %p2441_p6, %p2435_p13 }
  0xc4   : > { %2445 = shalt.err (!%p2442_p8)
}
  0xc5   : > { %2079 = dma.hbm_to_vmem [thread:$0]  (!%p2860_p12), %s2854_s23, 128, %s2856_s28, %s360_s7  }
  0xc6   : > { %s384_s18 = scalar_lea.vmem [#allocation6], %s1738_s3  ;;  %s380_s19 = sand.u32 1, %s2576_s14  }
  0xc7   : > { %s391_s21 = sshll.u32 %s384_s18, 4  ;;  %s2902_s27 = scalar_lea.hbm %s3141_s1, %s1849_s26  ;;  %s2895_s21 = int_to_ptr.vmem [resolvable:$true] %s391_s21 }
  0xc8   : > { %s2904_s2 = scalar_lea.sflag [#allocation7], %s380_s19  ;;  %s2446_s25 = scalar_lea.hbm %s2902_s27, 8192 }
  0xc9   : > { %p2447_p4 = scmp.ne.s32.totalorder %s2902_s27, %s2446_s25  ;;  %s2451_s28 = scalar_lea.hbm %s3141_s1, 65536 }
  0xca   : > { %p2452_p3 = scmp.lt.u32.totalorder %s2902_s27, %s3141_s1  ;;  %p2453_p5 = scmp.lt.u32.totalorder %s2451_s28, %s2446_s25 }
  0xcb   : > { %p2449_p9 = pnand %p2447_p4, %p2418_p0  ;;  %p2455_p13 = scmp.lt.u32.totalorder %s2446_s25, %s2902_s27 }
  0xcc   : > { %p2454_p11 = por %p2453_p5, %p2452_p3 }
  0xcd   : > { %p2450_p1 = pneg %p2449_p9 }
  0xce   : > { %p2456_p2 = por %p2455_p13, %p2454_p11 }
  0xd0   : > { %p2457_p7 = pnand %p2456_p2, %p2450_p1 }
  0xd2   : > { %2460 = shalt.err (!%p2457_p7)
}
  0xd3   : > { %s2461_s26 = scalar_lea.vmem %s2895_s21, 8192  ;;  %s2587_s18 = smov [#allocation6]  }
  0xd4   : > { %p2462_p6 = scmp.ne.s32.totalorder %s2895_s21, %s2461_s26  ;;  %s2466_s19 = sshll.u32 %s2587_s18, 4  ;;  %s2467_s19 = int_to_ptr.vmem [resolvable:$false] %s2466_s19 }
  0xd5   : > { %s2468_s9 = scalar_lea.vmem %s2467_s19, 16384  ;;  %p2469_p9 = scmp.lt.s32.totalorder %s2895_s21, %s2467_s19 }
  0xd6   : > { %p2464_p8 = pnand %p2462_p6, %p2418_p0  ;;  %p2470_p3 = scmp.lt.s32.totalorder %s2468_s9, %s2461_s26 }
  0xd8   : > { %p2465_p4 = pneg %p2464_p8  ;;  %p2471_p5 = por %p2470_p3, %p2469_p9 }
  0xda   : > { %p2472_p11 = pnand %p2471_p5, %p2465_p4 }
  0xdc   : > { %2475 = shalt.err (!%p2472_p11)
}
  0xdd   : > { %s3169_s25 = smov 4   ;;  %s3170_s30 = smov 64  }
  0xde   : > { %2082 = dma.hbm_to_vmem [thread:$0]  (!%p2860_p12), %s2902_s27, 8192, %s2895_s21, %s2904_s2, %s3170_s30, %s3170_s30, %s3169_s25  }
  0xdf   : > { %p3171_p0 = scmp.ne.s32.totalorder %s3160_s16, 0 }
  0xe0   : > { %s405_s22 = sand.u32 (!%p3171_p0), 1, %s2560_s10  }
  0xe1   : > { %403 = sbr.rel (%p3171_p0) target bundleno = 1241 (0x4d9), region = 56  ;;  %s1742_s23 = sshll.u32 (!%p3171_p0), %s405_s22, 3 }
  0xe2   : > { %s406_s28 = scalar_lea.sflag (!%p3171_p0), [#allocation4], %s405_s22  ;;  %s2936_s3 = scalar_lea.vmem (!%p3171_p0), [#allocation3], %s1742_s23 }
  0xe8   : > { %2527 = dma.done.wait (%p2836_p10), %s406_s28, 128  }
  0xe9   : > { %2529 = vsyncadd (%p2836_p10), %s406_s28, 4294967168  ;;  %s414_s20 = sand.u32 1, %s2674_s15   ;;  %s1743_s7 = sshll.u32 %s405_s22, 9 }
  0xea   : > { %s415_s21 = scalar_lea.sflag [#allocation7], %s414_s20  ;;  %s2943_s27 = scalar_lea.vmem [#allocation6], %s1743_s7 }
  0xeb   : > { %2531 = dma.done.wait (%p2836_p10), %s415_s21, 8192  }
  0xec   : > { %2533 = vsyncadd (%p2836_p10), %s415_s21, 4294959104  ;;  %p3172_p12 = scmp.eq.s32.totalorder %s2674_s15, 0 }
  0xee   : > { %2535 = dma.done.wait (%p3172_p12), [#allocation7], 16   ;;  %p3173_p1 = pmov %p3172_p12 }
  0xf0   : > { %2537 = vsyncadd (%p3173_p1), [#allocation7], 4294967280  ;;  %p3174_p13 = pmov %p3173_p1 }
  0xf1   : > { %p3175_p2 = pmov %p3173_p1 }
  0xf2   : > { %2539 = dma.done.wait (%p3174_p13), [#allocation10], 1040  }
  0xf3   : > { %2541 = vsyncadd (%p3175_p2), [#allocation10], 4294966256  ;;  %p3176_p7 = pmov %p3173_p1 }
  0xf4   : > { %p3177_p6 = pmov %p3173_p1 }
  0xf5   : > { %2543 = dma.done.wait (%p3176_p7), [#allocation13], 1040  }
  0xf6   : > { %2545 = vsyncadd (%p3177_p6), [#allocation13], 4294966256  ;;  %p3178_p10 = pmov %p3173_p1 }
  0xf7   : > { %p3179_p8 = pmov %p3173_p1 }
  0xf8   : > { %2547 = dma.done.wait (%p3178_p10), [#allocation16], 16  }
  0xf9   : > { %2549 = vsyncadd (%p3179_p8), [#allocation16], 4294967280  ;;  %p1750_p4 = scmp.ne.s32.totalorder %s2568_s12, 0 }
  0xfa   : > { %v2588_v0 = vmov (!%p1750_p4), 0.0  }
  0xfb   : > { %483 = sbr.rel (%p1750_p4) target bundleno = 258 (0x102), region = 92  ;;  %484 = vst [vmem:[#allocation2] sm:$0x3] (!%p1750_p4), %v2588_v0 }
 0x102 PF: > { %v2159_v1 = vld [vmem:[%s2943_s27 + $0x40] sm:$0xff]   ;;  %v2163_v5 = vld [vmem:[%s2943_s27 + $0x48] sm:$0xff]   ;;  %v2167_v9 = vld [vmem:[%s2943_s27 + $0x50] sm:$0xff]   ;;  %v620_v29 = vlaneseq  ;;  %v2589_v37 = vmov 1966171168   ;;  %p1815_p9 = scmp.ne.s32.totalorder %s2568_s12, 7 }
 0x103   : > { %v2160_v2 = vld [vmem:[%s2943_s27 + $0xc0] sm:$0xff]   ;;  %1850 = vmatprep.subr.bf16.mxu0 %v2159_v1  ;;  %v2164_v6 = vld [vmem:[%s2943_s27 + $0xc8] sm:$0xff]   ;;  %v2168_v10 = vld [vmem:[%s2943_s27 + $0xd0] sm:$0xff]   ;;  %v618_v38 = vunpack.c.l.s4 %v2589_v37  ;;  %vm2591_vm0 = vmmov (!%p1815_p9), 0   ;;  %s3180_s17 = sld [smem:[#allocation27_spill]] (!%p1815_p9)  ;;  %vm1571_vm1 = vcmask (!%p1815_p9), 74752  }
 0x104   : > { %v2161_v3 = vld [vmem:[%s2943_s27] sm:$0xff]   ;;  %1872 = vmatprep.subr.bf16.mxu1 %v2160_v2  ;;  %v2165_v7 = vld [vmem:[%s2943_s27 + $0x8] sm:$0xff]   ;;  %v2169_v11 = vld [vmem:[%s2943_s27 + $0x10] sm:$0xff]   ;;  %v621_v34 = vshrl.u32 %v620_v29, 7 }
 0x105   : > { %v2162_v4 = vld [vmem:[%s2943_s27 + $0x80] sm:$0xff]   ;;  %1851 = vmatpush3.bf16.msra.mxu0 %v2161_v3  ;;  %v2166_v8 = vld [vmem:[%s2943_s27 + $0x88] sm:$0xff]   ;;  %v2170_v12 = vld [vmem:[%s2943_s27 + $0x90] sm:$0xff]   ;;  %v619_v41 = vunpack.c.0.s8 %v618_v38 }
 0x106   : > { %1873 = vmatpush3.bf16.msra.mxu1 %v2162_v4  ;;  %1852 = vmatprep.subr.bf16.mxu0 %v2163_v5  ;;  %v2171_v13 = vld [vmem:[%s2943_s27 + $0x58] sm:$0xff]   ;;  %v2175_v17 = vld [vmem:[%s2943_s27 + $0x60] sm:$0xff]   ;;  %v2179_v21 = vld [vmem:[%s2943_s27 + $0x68] sm:$0xff]  }
 0x107   : > { %1874 = vmatprep.subr.bf16.mxu1 %v2164_v6  ;;  %v2172_v14 = vld [vmem:[%s2943_s27 + $0xd8] sm:$0xff]   ;;  %v2176_v18 = vld [vmem:[%s2943_s27 + $0xe0] sm:$0xff]   ;;  %v2180_v22 = vld [vmem:[%s2943_s27 + $0xe8] sm:$0xff]   ;;  %v3001_v42 = vsub.s32 %v619_v41, %v621_v34 }
 0x108   : > { %v2173_v15 = vld [vmem:[%s2943_s27 + $0x18] sm:$0xff]   ;;  %v2177_v19 = vld [vmem:[%s2943_s27 + $0x20] sm:$0xff]   ;;  %v2181_v23 = vld [vmem:[%s2943_s27 + $0x28] sm:$0xff]  }
 0x109   : > { %1853 = vmatpush3.bf16.msra.mxu0 %v2165_v7  ;;  %v2174_v16 = vld [vmem:[%s2943_s27 + $0x98] sm:$0xff]   ;;  %v2178_v20 = vld [vmem:[%s2943_s27 + $0xa0] sm:$0xff]   ;;  %v2182_v24 = vld [vmem:[%s2943_s27 + $0xa8] sm:$0xff]  }
 0x10a   : > { %1875 = vmatpush3.bf16.msra.mxu1 %v2166_v8  ;;  %1854 = vmatprep.subr.bf16.mxu0 %v2167_v9  ;;  %v2183_v25 = vld [vmem:[%s2943_s27 + $0x70] sm:$0xff]   ;;  %v2187_v30 = vld [vmem:[%s2943_s27 + $0x78] sm:$0xff]   ;;  %v2192_v36 = vld [vmem:[%s2943_s27 + $0x140] sm:$0xff]  }
 0x10b   : > { %1876 = vmatprep.subr.bf16.mxu1 %v2168_v10  ;;  %v2184_v26 = vld [vmem:[%s2943_s27 + $0xf0] sm:$0xff]   ;;  %v2188_v31 = vld [vmem:[%s2943_s27 + $0xf8] sm:$0xff]   ;;  %v2193_v39 = vld [vmem:[%s2943_s27 + $0x1c0] sm:$0xff]  }
 0x10c   : > { %v2185_v27 = vld [vmem:[%s2943_s27 + $0x30] sm:$0xff]   ;;  %v2189_v32 = vld [vmem:[%s2943_s27 + $0x38] sm:$0xff]   ;;  %v2194_v49 = vld [vmem:[%s2943_s27 + $0x100] sm:$0xff]  }
 0x10d   : > { %1855 = vmatpush3.bf16.msra.mxu0 %v2169_v11  ;;  %v2186_v28 = vld [vmem:[%s2943_s27 + $0xb0] sm:$0xff]   ;;  %v2190_v33 = vld [vmem:[%s2943_s27 + $0xb8] sm:$0xff]   ;;  %v2196_v52 = vld [vmem:[%s2943_s27 + $0x148] sm:$0xff]  }
 0x10e   : > { %1877 = vmatpush3.bf16.msra.mxu1 %v2170_v12  ;;  %1856 = vmatprep.subr.bf16.mxu0 %v2171_v13  ;;  %v486_v35 = vld [vmem:[%s2936_s3] sm:$0xff]  ;;  %v2195_v54 = vld [vmem:[%s2943_s27 + $0x180] sm:$0xff]   ;;  %v2197_v55 = vld [vmem:[%s2943_s27 + $0x1c8] sm:$0xff]  }
 0x10f   : > { %1878 = vmatprep.subr.bf16.mxu1 %v2172_v14  ;;  %v616_v40 = vcombine.high %v486_v35, %v486_v35  ;;  %v623_v43 = vrot.slane %v486_v35, %v3001_v42  ;;  %v2198_v57 = vld [vmem:[%s2943_s27 + $0x108] sm:$0xff]   ;;  %v2200_v58 = vld [vmem:[%s2943_s27 + $0x150] sm:$0xff]   ;;  %v2204_v62 = vld [vmem:[%s2943_s27 + $0x158] sm:$0xff]  }
 0x110   : > { %v2199_v59 = vld [vmem:[%s2943_s27 + $0x188] sm:$0xff]   ;;  %v2201_v60 = vld [vmem:[%s2943_s27 + $0x1d0] sm:$0xff]   ;;  %v2205_v0 = vld [vmem:[%s2943_s27 + $0x1d8] sm:$0xff]  }
 0x111   : > { %1857 = vmatpush3.bf16.msra.mxu0 %v2173_v15  ;;  %v3005_v44 = vrot.slane %v616_v40, %v3001_v42  ;;  %v631_v45 = vcombine.high %v623_v43, %v623_v43  ;;  %v639_v46 = vrot.slane %v623_v43, %v3001_v42  ;;  %v2202_v61 = vld [vmem:[%s2943_s27 + $0x110] sm:$0xff]   ;;  %v2206_v1 = vld [vmem:[%s2943_s27 + $0x118] sm:$0xff]   ;;  %v2208_v2 = vld [vmem:[%s2943_s27 + $0x160] sm:$0xff]  }
 0x112   : > { %1879 = vmatpush3.bf16.msra.mxu1 %v2174_v16  ;;  %1858 = vmatprep.subr.bf16.mxu0 %v2175_v17  ;;  %v2203_v63 = vld [vmem:[%s2943_s27 + $0x190] sm:$0xff]   ;;  %v2207_v3 = vld [vmem:[%s2943_s27 + $0x198] sm:$0xff]   ;;  %v2209_v4 = vld [vmem:[%s2943_s27 + $0x1e0] sm:$0xff]  }
 0x113   : > { %1880 = vmatprep.subr.bf16.mxu1 %v2176_v18  ;;  %v632_v47 = vcombine.high %v3005_v44, %v3005_v44  ;;  %v653_v48 = vrot.slane %v631_v45, %v3001_v42  ;;  %v661_v51 = vcombine.high %v639_v46, %v639_v46  ;;  %v2210_v5 = vld [vmem:[%s2943_s27 + $0x120] sm:$0xff]   ;;  %v2212_v6 = vld [vmem:[%s2943_s27 + $0x168] sm:$0xff]   ;;  %v2216_v10 = vld [vmem:[%s2943_s27 + $0x170] sm:$0xff]   ;;  %v646_v18 = vrot.slane %v3005_v44, %v3001_v42 }
 0x114   : > { %v2211_v7 = vld [vmem:[%s2943_s27 + $0x1a0] sm:$0xff]   ;;  %v2213_v8 = vld [vmem:[%s2943_s27 + $0x1e8] sm:$0xff]   ;;  %v2217_v12 = vld [vmem:[%s2943_s27 + $0x1f0] sm:$0xff]  }
 0x115   : > { %1859 = vmatpush3.bf16.msra.mxu0 %v2177_v19  ;;  %v660_v50 = vrot.slane %v632_v47, %v3001_v42  ;;  %1089 = vmatprep.mubr.bf16.mxu0 %v653_v48  ;;  %v663_v53 = vcombine.high %v653_v48, %v653_v48  ;;  %v2214_v9 = vld [vmem:[%s2943_s27 + $0x128] sm:$0xff]   ;;  %v2218_v13 = vld [vmem:[%s2943_s27 + $0x130] sm:$0xff]   ;;  %v2220_v14 = vld [vmem:[%s2943_s27 + $0x178] sm:$0xff]   ;;  %v2590_v47 = vmov (!%p1815_p9), 0.0  }
 0x116   : > { %1881 = vmatpush3.bf16.msra.mxu1 %v2178_v20  ;;  %1860 = vmatprep.subr.bf16.mxu0 %v2179_v21  ;;  %v2215_v11 = vld [vmem:[%s2943_s27 + $0x1a8] sm:$0xff]   ;;  %v2219_v15 = vld [vmem:[%s2943_s27 + $0x1b0] sm:$0xff]   ;;  %v2221_v16 = vld [vmem:[%s2943_s27 + $0x1f8] sm:$0xff]   ;;  %v662_v20 = vcombine.high %v646_v18, %v646_v18 }
 0x117   : > { %1882 = vmatprep.subr.bf16.mxu1 %v2180_v22  ;;  %v664_v56 = vcombine.high %v660_v50, %v660_v50  ;;  %1129 = vmatprep.mubr.bf16.mxu1 %v663_v53  ;;  %v2222_v17 = vld [vmem:[%s2943_s27 + $0x138] sm:$0xff]   ;;  %v485_v42 = vld [vmem:[#allocation2] sm:$0x3]  ;;  %v2228_v53 = vld [vmem:[#allocation9 + $0x20] sm:$0xff] (!%p1815_p9)  }
 0x118   : > { %v2223_v19 = vld [vmem:[%s2943_s27 + $0x1b8] sm:$0xff]   ;;  %v2225_v48 = vld [vmem:[#allocation9 + $0x8] sm:$0xff] (!%p1815_p9)  }
 0x119   : > { %1861 = vmatpush3.bf16.msra.mxu0 %v2181_v23 }
 0x11a   : > { %1883 = vmatpush3.bf16.msra.mxu1 %v2182_v24  ;;  %1862 = vmatprep.subr.bf16.mxu0 %v2183_v25 }
 0x11b   : > { %1884 = vmatprep.subr.bf16.mxu1 %v2184_v26 }
 0x11d   : > { %1863 = vmatpush3.bf16.msra.mxu0 %v2185_v27 }
 0x11e   : > { %1885 = vmatpush3.bf16.msra.mxu1 %v2186_v28  ;;  %1864 = vmatprep.subr.bf16.mxu0 %v2187_v30 }
 0x11f   : > { %1886 = vmatprep.subr.bf16.mxu1 %v2188_v31 }
 0x121   : > { %1865 = vmatpush3.bf16.msra.mxu0 %v2189_v32 }
 0x122   : > { %1887 = vmatpush3.bf16.msra.mxu1 %v2190_v33  ;;  %1894 = vmatprep.subr.bf16.mxu0 %v2192_v36 }
 0x123   : > { %1916 = vmatprep.subr.bf16.mxu1 %v2193_v39 }
 0x124   : > { %1090 = vmatmul.mubr.bf16.vlgmr.msra.gmra.mrb[0].mxu0 %v639_v46  ;;  %v2224_v46 = vld [vmem:[#allocation9] sm:$0xff] (!%p1815_p9)  }
 0x125   : > { %1895 = vmatpush3.bf16.msra.mxu0 %v2194_v49  ;;  %1130 = vmatmul.mubr.bf16.vlgmr.msra.gmra.mrb[0].mxu1 %v661_v51  ;;  %v2226_v49 = vld [vmem:[#allocation9 + $0x10] sm:$0xff] (!%p1815_p9)   ;;  %v2227_v51 = vld [vmem:[#allocation9 + $0x18] sm:$0xff] (!%p1815_p9)  }
 0x126   : > { %1896 = vmatprep.subr.bf16.mxu0 %v2196_v52  ;;  %1917 = vmatpush3.bf16.msra.mxu1 %v2195_v54  ;;  %v2233_v52 = vld [vmem:[#allocation12 + $0x8] sm:$0xff] (!%p1815_p9)   ;;  %v2234_v54 = vld [vmem:[#allocation12 + $0x10] sm:$0xff] (!%p1815_p9)  }
 0x127   : > { %1169 = vmatprep.mubr.bf16.mxu0 %v660_v50  ;;  %1918 = vmatprep.subr.bf16.mxu1 %v2197_v55  ;;  %v2232_v50 = vld [vmem:[#allocation12] sm:$0xff] (!%p1815_p9)  }
 0x128   : > { %1209 = vmatprep.mubr.bf16.mxu1 %v664_v56  ;;  %v2229_v55 = vld [vmem:[#allocation9 + $0x28] sm:$0xff] (!%p1815_p9)  }
 0x129   : > { %1897 = vmatpush3.bf16.msra.mxu0 %v2198_v57  ;;  %v1816_v57 = vld [vmem:[#allocation8] ss:$0 sm:$0xff] (!%p1815_p9) }
 0x12a   : > { %1898 = vmatprep.subr.bf16.mxu0 %v2200_v58  ;;  %1919 = vmatpush3.bf16.msra.mxu1 %v2199_v59  ;;  %v2235_v58 = vld [vmem:[#allocation12 + $0x18] sm:$0xff] (!%p1815_p9)  }
 0x12b   : > { %1920 = vmatprep.subr.bf16.mxu1 %v2201_v60  ;;  %v2230_v60 = vld [vmem:[#allocation9 + $0x30] sm:$0xff] (!%p1815_p9)  }
 0x12d   : > { %1899 = vmatpush3.bf16.msra.mxu0 %v2202_v61  ;;  %v2236_v61 = vld [vmem:[#allocation12 + $0x20] sm:$0xff] (!%p1815_p9)  }
 0x12e   : > { %1900 = vmatprep.subr.bf16.mxu0 %v2204_v62  ;;  %1921 = vmatpush3.bf16.msra.mxu1 %v2203_v63  ;;  %v2231_v63 = vld [vmem:[#allocation9 + $0x38] sm:$0xff] (!%p1815_p9)  }
 0x12f   : > { %1922 = vmatprep.subr.bf16.mxu1 %v2205_v0  ;;  %v2237_v0 = vld [vmem:[#allocation12 + $0x28] sm:$0xff] (!%p1815_p9)  }
 0x131   : > { %1901 = vmatpush3.bf16.msra.mxu0 %v2206_v1 }
 0x132   : > { %1902 = vmatprep.subr.bf16.mxu0 %v2208_v2  ;;  %1923 = vmatpush3.bf16.msra.mxu1 %v2207_v3  ;;  %v2238_v2 = vld [vmem:[#allocation12 + $0x30] sm:$0xff] (!%p1815_p9)   ;;  %v2239_v3 = vld [vmem:[#allocation12 + $0x38] sm:$0xff] (!%p1815_p9)  }
 0x133   : > { %1924 = vmatprep.subr.bf16.mxu1 %v2209_v4  ;;  %v2240_v4 = vld [vmem:[%s3180_s17] sm:$0xff] (!%p1815_p9)  }
 0x135   : > { %1903 = vmatpush3.bf16.msra.mxu0 %v2210_v5  ;;  %v2241_v5 = vld [vmem:[%s3180_s17 + $0x8] sm:$0xff] (!%p1815_p9)  }
 0x136   : > { %1904 = vmatprep.subr.bf16.mxu0 %v2212_v6  ;;  %1925 = vmatpush3.bf16.msra.mxu1 %v2211_v7  ;;  %v2242_v6 = vld [vmem:[%s3180_s17 + $0x10] sm:$0xff] (!%p1815_p9)   ;;  %v2243_v7 = vld [vmem:[%s3180_s17 + $0x18] sm:$0xff] (!%p1815_p9)  }
 0x137   : > { %1926 = vmatprep.subr.bf16.mxu1 %v2213_v8  ;;  %v2244_v8 = vld [vmem:[%s3180_s17 + $0x20] sm:$0xff] (!%p1815_p9)  }
 0x139   : > { %1905 = vmatpush3.bf16.msra.mxu0 %v2214_v9  ;;  %v2245_v9 = vld [vmem:[%s3180_s17 + $0x28] sm:$0xff] (!%p1815_p9)  }
 0x13a   : > { %1906 = vmatprep.subr.bf16.mxu0 %v2216_v10  ;;  %1927 = vmatpush3.bf16.msra.mxu1 %v2215_v11  ;;  %v1817_v10 = vld [vmem:[#allocation11] ss:$0 sm:$0xff] (!%p1815_p9) }
 0x13b   : > { %1928 = vmatprep.subr.bf16.mxu1 %v2217_v12 }
 0x13d   : > { %1907 = vmatpush3.bf16.msra.mxu0 %v2218_v13 }
 0x13e   : > { %1908 = vmatprep.subr.bf16.mxu0 %v2220_v14  ;;  %1929 = vmatpush3.bf16.msra.mxu1 %v2219_v15 }
 0x13f   : > { %1930 = vmatprep.subr.bf16.mxu1 %v2221_v16 }
 0x141   : > { %1909 = vmatpush3.bf16.msra.mxu0 %v2222_v17 }
 0x142   : > { %1931 = vmatpush3.bf16.msra.mxu1 %v2223_v19  ;;  %1965 = vmatprep.subr.bf16.mxu0 (!%p1815_p9), %v2590_v47  ;;  %v2247_v19 = vld [vmem:[%s3180_s17 + $0x38] sm:$0xff] (!%p1815_p9)  }
 0x143   : > { %1985 = vmatprep.subr.bf16.mxu1 (!%p1815_p9), %v2590_v47 }
 0x144   : > { %1170 = vmatmul.mubr.bf16.vlgmr.msra.gmra.mrb[4].mxu0 %v646_v18  ;;  %v2246_v18 = vld [vmem:[%s3180_s17 + $0x30] sm:$0xff] (!%p1815_p9)  }
 0x145   : > { %1210 = vmatmul.mubr.bf16.vlgmr.msra.gmra.mrb[4].mxu1 %v662_v20  ;;  %1966 = vmatpush3.bf16.msra.mxu0 (!%p1815_p9), %v2224_v46  ;;  %v1826_v20 = vld [vmem:[#allocation14] ss:$0 sm:$0xff] (!%p1815_p9) }
 0x146   : > { %1981 = vmatprep.mubr.msk.bf16.mxu0 (!%p1815_p9), %vm2591_vm0, %v2590_v47  ;;  %1967 = vmatprep.subr.bf16.mxu0 (!%p1815_p9), %v2590_v47 }
 0x147   : > { %2001 = vmatprep.mubr.msk.bf16.mxu1 (!%p1815_p9), %vm2591_vm0, %v2590_v47  ;;  %1986 = vmatpush3.bf16.msra.mxu1 (!%p1815_p9), %v2232_v50 }
 0x148   : > { %1987 = vmatprep.subr.bf16.mxu1 (!%p1815_p9), %v2590_v47 }
 0x149   : > { %1968 = vmatpush3.bf16.msra.mxu0 (!%p1815_p9), %v2225_v48 }
 0x14a   : > { %1969 = vmatprep.subr.bf16.mxu0 (!%p1815_p9), %v2590_v47 }
 0x14b   : > { %1988 = vmatpush3.bf16.msra.mxu1 (!%p1815_p9), %v2233_v52 }
 0x14c   : > { %1989 = vmatprep.subr.bf16.mxu1 (!%p1815_p9), %v2590_v47 }
 0x14d   : > { %1970 = vmatpush3.bf16.msra.mxu0 (!%p1815_p9), %v2226_v49 }
 0x14e   : > { %1971 = vmatprep.subr.bf16.mxu0 (!%p1815_p9), %v2590_v47 }
 0x14f   : > { %1990 = vmatpush3.bf16.msra.mxu1 (!%p1815_p9), %v2234_v54 }
 0x150   : > { %1991 = vmatprep.subr.bf16.mxu1 (!%p1815_p9), %v2590_v47 }
 0x151   : > { %1972 = vmatpush3.bf16.msra.mxu0 (!%p1815_p9), %v2227_v51 }
 0x152   : > { %1973 = vmatprep.subr.bf16.mxu0 (!%p1815_p9), %v2590_v47 }
 0x153   : > { %1992 = vmatpush3.bf16.msra.mxu1 (!%p1815_p9), %v2235_v58 }
 0x154   : > { %1993 = vmatprep.subr.bf16.mxu1 (!%p1815_p9), %v2590_v47 }
 0x155   : > { %1974 = vmatpush3.bf16.msra.mxu0 (!%p1815_p9), %v2228_v53 }
 0x156   : > { %1975 = vmatprep.subr.bf16.mxu0 (!%p1815_p9), %v2590_v47 }
 0x157   : > { %1994 = vmatpush3.bf16.msra.mxu1 (!%p1815_p9), %v2236_v61 }
 0x158   : > { %1995 = vmatprep.subr.bf16.mxu1 (!%p1815_p9), %v2590_v47 }
 0x159   : > { %1976 = vmatpush3.bf16.msra.mxu0 (!%p1815_p9), %v2229_v55 }
 0x15a   : > { %1977 = vmatprep.subr.bf16.mxu0 (!%p1815_p9), %v2590_v47 }
 0x15b   : > { %1996 = vmatpush3.bf16.msra.mxu1 (!%p1815_p9), %v2237_v0 }
 0x15c   : > { %1997 = vmatprep.subr.bf16.mxu1 (!%p1815_p9), %v2590_v47 }
 0x15d   : > { %1978 = vmatpush3.bf16.msra.mxu0 (!%p1815_p9), %v2230_v60 }
 0x15e   : > { %1979 = vmatprep.subr.bf16.mxu0 (!%p1815_p9), %v2590_v47 }
 0x15f   : > { %1998 = vmatpush3.bf16.msra.mxu1 (!%p1815_p9), %v2238_v2 }
 0x160   : > { %1999 = vmatprep.subr.bf16.mxu1 (!%p1815_p9), %v2590_v47 }
 0x161   : > { %1980 = vmatpush3.bf16.msra.mxu0 (!%p1815_p9), %v2231_v63 }
 0x162   : > { %2005 = vmatprep.subr.bf16.mxu0 (!%p1815_p9), %v2590_v47 }
 0x163   : > { %2000 = vmatpush3.bf16.msra.mxu1 (!%p1815_p9), %v2239_v3 }
 0x1f7   : > { %v1866_v21 = vpop.f32.mrb[0].mxu0 }
 0x1f8   : > { %v1867_v22 = vpop.f32.mrb[1].mxu0  ;;  %v1888_v23 = vpop.f32.mrb[0].mxu1 }
 0x1f9   : > { %v1868_v24 = vadd.f32 %v1867_v22, %v1866_v21  ;;  %v1869_v25 = vpop.f32.mrb[2].mxu0  ;;  %v1889_v26 = vpop.f32.mrb[1].mxu1 }
 0x1fa   : > { %v1870_v27 = vpop.f32.mrb[3].mxu0  ;;  %v1890_v28 = vadd.f32 %v1889_v26, %v1888_v23  ;;  %v1891_v29 = vpop.f32.mrb[2].mxu1 }
 0x1fb   : > { %v1892_v30 = vpop.f32.mrb[3].mxu1 }
 0x1fc   : > { %v1132_v31 = vadd.f32 %v1890_v28, %v1868_v24  ;;  %v1835_v28 = vld [vmem:[#allocation15] ss:$0 sm:$0xff] (!%p1815_p9) }
 0x217   : > { %v1910_v32 = vpop.f32.mrb[4].mxu0 }
 0x218   : > { %v1911_v33 = vpop.f32.mrb[5].mxu0  ;;  %v1932_v34 = vpop.f32.mrb[4].mxu1 }
 0x219   : > { %v1912_v35 = vadd.f32 %v1911_v33, %v1910_v32  ;;  %v1913_v36 = vpop.f32.mrb[6].mxu0  ;;  %v1933_v37 = vpop.f32.mrb[5].mxu1 }
 0x21a   : > { %v1914_v38 = vpop.f32.mrb[7].mxu0  ;;  %v1934_v40 = vadd.f32 %v1933_v37, %v1932_v34  ;;  %v1935_v41 = vpop.f32.mrb[6].mxu1 }
 0x21b   : > { %v1172_v39 = vadd.f32 %v1912_v35, %v1132_v31  ;;  %v1936_v43 = vpop.f32.mrb[7].mxu1  ;;  %1222 = sbr.rel (%p1815_p9) target bundleno = 1210 (0x4ba), region = 96 }
 0x21d   : > { %v1212_v44 = vadd.f32 %v1934_v40, %v1172_v39 }
 0x21f   : > { %v1217_v45 = vadd.f32 %v1212_v44, %v485_v42 }
 0x221   : > { %1218 = vst [vmem:[#allocation2] sm:$0x3] %v1217_v45 }
 0x228   : > { %v1223_v56 = vld [vmem:[#allocation2] sm:$0x3] }
 0x229   : > { %v1231_v59 = vadd.f32 %v1816_v57, %v1223_v56 }
 0x22b   : > { %v1232_v62 = vmax.f32 %v1231_v59, 0.0 }
 0x22d   : > { %v1233_v1 = vpack.c.bf16 %v1232_v62, %v1232_v62 }
 0x22f   : > { %1982 = vmatmul.mubr.bf16.vlgmr.msra.gmra.mrb[0].mxu0 %v1233_v1 }
 0x230   : > { %2021 = vmatprep.mubr.msk.bf16.mxu0 %vm2591_vm0, %v2590_v47  ;;  %2006 = vmatpush3.bf16.msra.mxu0 %v2240_v4 }
 0x231   : > { %2007 = vmatprep.subr.bf16.mxu0 %v2590_v47 }
 0x234   : > { %2008 = vmatpush3.bf16.msra.mxu0 %v2241_v5 }
 0x235   : > { %2009 = vmatprep.subr.bf16.mxu0 %v2590_v47 }
 0x238   : > { %2010 = vmatpush3.bf16.msra.mxu0 %v2242_v6 }
 0x239   : > { %2011 = vmatprep.subr.bf16.mxu0 %v2590_v47 }
 0x23c   : > { %2012 = vmatpush3.bf16.msra.mxu0 %v2243_v7 }
 0x23d   : > { %2013 = vmatprep.subr.bf16.mxu0 %v2590_v47 }
 0x240   : > { %2014 = vmatpush3.bf16.msra.mxu0 %v2244_v8 }
 0x241   : > { %2015 = vmatprep.subr.bf16.mxu0 %v2590_v47 }
 0x244   : > { %2016 = vmatpush3.bf16.msra.mxu0 %v2245_v9 }
 0x245   : > { %2017 = vmatprep.subr.bf16.mxu0 %v2590_v47 }
 0x248   : > { %2018 = vmatpush3.bf16.msra.mxu0 %v2246_v18 }
 0x249   : > { %2019 = vmatprep.subr.bf16.mxu0 %v2590_v47 }
 0x24c   : > { %2020 = vmatpush3.bf16.msra.mxu0 %v2247_v19 }
 0x302   : > { %v1339_v11 = vpop.f32.mrb[0].mxu0 }
 0x303   : > { %v1340_v12 = vadd.f32 %v1817_v10, %v1339_v11  ;;  %v1983_v13 = vpop.f32.mrb[1].mxu0 }
 0x304   : > { %v1342_v14 = vpop.f32.mrb[2].mxu0 }
 0x305   : > { %v1345_v15 = vmax.f32 %v1340_v12, 0.0  ;;  %v1984_v16 = vpop.f32.mrb[3].mxu0 }
 0x307   : > { %v1346_v17 = vpack.c.bf16 %v1345_v15, %v1345_v15 }
 0x309   : > { %2002 = vmatmul.mubr.bf16.vlgmr.msra.gmra.mrb[0].mxu1 %v1346_v17 }
 0x3dc   : > { %v1452_v21 = vpop.f32.mrb[0].mxu1 }
 0x3dd   : > { %v1453_v22 = vadd.f32 %v1826_v20, %v1452_v21  ;;  %v2003_v23 = vpop.f32.mrb[1].mxu1 }
 0x3de   : > { %v1455_v24 = vpop.f32.mrb[2].mxu1 }
 0x3df   : > { %v1458_v25 = vmax.f32 %v1453_v22, 0.0  ;;  %v2004_v26 = vpop.f32.mrb[3].mxu1 }
 0x3e1   : > { %v1459_v27 = vpack.c.bf16 %v1458_v25, %v1458_v25 }
 0x3e3   : > { %2022 = vmatmul.mubr.bf16.vlgmr.msra.gmra.mrb[4].mxu0 %v1459_v27 }
 0x4b6   : > { %v1565_v29 = vpop.f32.mrb[4].mxu0 }
 0x4b7   : > { %v1566_v30 = vadd.f32 %v1835_v28, %v1565_v29  ;;  %v2023_v31 = vpop.f32.mrb[5].mxu0 }
 0x4b8   : > { %v1568_v32 = vpop.f32.mrb[6].mxu0 }
 0x4b9   : > { %1572 = vst.msk [vmem:[#allocation17] sm:$0x3] %vm1571_vm1, %v1566_v30  ;;  %v2024_v33 = vpop.f32.mrb[7].mxu0 }
 0x4ba PF: > { %p2096_p3 = scmp.eq.s32.totalorder %s2674_s15, 7  ;;  %s2592_s27 = smov [#allocation17]  }
 0x4bb   : > { %s1582_s12 = sshll.u32 %s2592_s27, 4  ;;  %s1583_s12 = int_to_ptr.vmem [resolvable:$true] %s1582_s12 }
 0x4bc   : > { %s2476_s16 = scalar_lea.vmem %s1583_s12, 32  ;;  %p2483_p12 = scmp.lt.s32.totalorder %s1583_s12, %s1583_s12 }
 0x4bd   : > { %p2477_p5 = scmp.ne.s32.totalorder %s1583_s12, %s2476_s16  ;;  %p2484_p1 = scmp.lt.s32.totalorder %s2476_s16, %s2476_s16 }
 0x4bf   : > { %p2478_p11 = pnand %p2477_p5, %p2096_p3  ;;  %p2485_p13 = por %p2484_p1, %p2483_p12 }
 0x4c1   : > { %p2479_p0 = pneg %p2478_p11 }
 0x4c3   : > { %p2486_p2 = pnand %p2485_p13, %p2479_p0 }
 0x4c5   : > { %2489 = shalt.err (!%p2486_p2)
}
 0x4c6   : > { %s3181_s18 = sld [smem:[#allocation28_spill]] }
 0x4cc   : > { %s2490_s19 = scalar_lea.hbm %s3181_s18, 32 }
 0x4cd   : > { %p2491_p7 = scmp.ne.s32.totalorder %s3181_s18, %s2490_s19  ;;  %p2496_p8 = scmp.lt.u32.totalorder %s2490_s19, %s3181_s18 }
 0x4cf   : > { %p2492_p6 = pnand %p2491_p7, %p2096_p3 }
 0x4d1   : > { %p2493_p10 = pneg %p2492_p6 }
 0x4d3   : > { %p2498_p4 = pnand %p2496_p8, %p2493_p10 }
 0x4d5   : > { %2501 = shalt.err (!%p2498_p4)
}
 0x4d6   : > { %2054 = dma.vmem_to_hbm [thread:$0]  (%p2096_p3), %s1583_s12, 32, %s3181_s18, [#allocation5]  }
 0x4d7   : > { %2551 = dma.done.wait (%p2096_p3), [#allocation5], 32  }
 0x4d8   : > { %2553 = vsyncadd (%p2096_p3), [#allocation5], 4294967264 }
 0x4d9 PF: > { %s29_s14 = sadd.s32 1, %s2576_s14   ;;  %s3182_s30 = smov %s2560_s10 }
 0x4da   : > { %p26_p9 = scmp.ge.s32.totalorder %s29_s14, 10   ;;  %s3183_s10 = smov %s2564_s11 }
 0x4db   : > { %s3184_s11 = smov %s2848_s24  ;;  %s3185_s12 = smov %s2572_s13 }
 0x4dc   : > { %s3186_s13 = smov %s3188_s29  ;;  %28 = sbr.rel (!%p26_p9) target bundleno = 15 (0xf), region = 139 }
 0x4e3   :  { %1595 = vsyncpa [#allocation4], 1 }
 0x4e4   :  { %1597 = vsyncpa [#allocation4 + $0x1], 1 }
 0x4e5   :  { %1598 = vsyncpa [#allocation7], 1 }
 0x4e6   :  { %1600 = vsyncpa [#allocation7 + $0x1], 1 }
 0x4e7   :  { %1601 = vsyncpa [#allocation10], 1 }
 0x4e8   :  { %1602 = vsyncpa [#allocation13], 1 }
 0x4e9   :  { %1603 = vsyncpa [#allocation16], 1 }
 0x4ea   :  { %1604 = vsyncpa [#allocation5], 1 }
 0x4eb   :  { %1606 = vsyncpa [#allocation5 + $0x1], 1 }

</bundles_post_ra>
